<compile_context>
chip_gen: v5e
topology: v5e:2x2
jax: 0.10.0
libtpu: 0.0.40
codegen_flags: <defaults>
</compile_context>

<pallas_src>
import functools

import jax
import jax.numpy as jnp
from jax.experimental import pallas as pl
from jax.experimental.pallas import tpu as pltpu


def _pad8(n: int) -> int:
    return ((n + 7) // 8) * 8


def _round_up(n: int, m: int) -> int:
    return ((n + m - 1) // m) * m


# ---------------------------------------------------------------------------
# Pallas kernel: structured DeepPoly verifier head (pure VPU, lane-dense)
#
#   inputs  lb, ub   : (N, tb)  labels on sublanes, batch on lanes
#   outputs lbo, ubo : (M, tb)  M = N - 1, true_label row dropped
#       lbo[i, :] = lb[t, :] - ub[keep_idx[i], :]
#       ubo[i, :] = ub[t, :] - lb[keep_idx[i], :]
# ---------------------------------------------------------------------------
def _dp_verifier_kernel(lb_ref, ub_ref, lbo_ref, ubo_ref, *, true_label,
                        num_labels):
    t = true_label
    n = num_labels

    lb = lb_ref[...].astype(jnp.float32)          # (N, tb)
    ub = ub_ref[...].astype(jnp.float32)

    lb_t = lb[t:t + 1, :]                         # (1, tb) sublane-broadcast
    ub_t = ub[t:t + 1, :]

    # Each segment is written directly, so the "drop row t" gather is a static
    # sublane slice and every store is a full-lane (unmasked) vst.
    if t > 0:
        lbo_ref[:t, :] = lb_t - ub[:t, :]
        ubo_ref[:t, :] = ub_t - lb[:t, :]
    if t < n - 1:
        lbo_ref[t:, :] = lb_t - ub[t + 1:, :]
        ubo_ref[t:, :] = ub_t - lb[t + 1:, :]


def _pick_batch_tile(B, N, M, *, vmem_budget_bytes=20 * 1024 * 1024,
                     min_tile=512, min_steps=2):
    """Largest lane-dense batch tile fitting a double-buffered VMEM budget."""
    if B <= min_tile:
        return B                                  # single full-extent block
    # Per batch column (one lane), per grid step, double buffered:
    #   2 inputs  x pad8(N) sublanes x 4B x 2 buffers
    # + 2 outputs x pad8(M) sublanes x 4B x 2 buffers
    per_col = 16 * (_pad8(N) + _pad8(M))
    tb = max(min_tile, (vmem_budget_bytes // per_col) // 128 * 128)
    # Keep >= min_steps grid steps so the batch axis can shard across v7x's
    # two TensorCores and the input/output pipeline has work to overlap.
    tb = min(tb, _round_up(pl.cdiv(B, min_steps), 128))
    tb = min(tb, _round_up(B, 128))
    return tb


def dp_verifier_forward_labels_first(lbounds_t, ubounds_t, *, true_label):
    """Fast path: lane-dense (N, B) bounds -> ((M, B), (M, B)) f32 outputs."""
    N, B = lbounds_t.shape
    assert ubounds_t.shape == (N, B)
    t = int(true_label)
    assert 0 <= t < N
    M = N - 1

    tb = _pick_batch_tile(B, N, M)
    grid = (pl.cdiv(B, tb),)

    kernel = functools.partial(_dp_verifier_kernel, true_label=t, num_labels=N)

    lbo, ubo = pl.pallas_call(
        kernel,
        out_shape=(jax.ShapeDtypeStruct((M, B), jnp.float32),
                   jax.ShapeDtypeStruct((M, B), jnp.float32)),
        grid=grid,
        in_specs=[
            pl.BlockSpec((N, tb), lambda i: (0, i)),   # lbounds (N, B)
            pl.BlockSpec((N, tb), lambda i: (0, i)),   # ubounds (N, B)
        ],
        out_specs=(pl.BlockSpec((M, tb), lambda i: (0, i)),
                   pl.BlockSpec((M, tb), lambda i: (0, i))),
        compiler_params=pltpu.CompilerParams(
            dimension_semantics=("parallel",),
            vmem_limit_bytes=32 * 1024 * 1024),
    )(lbounds_t, ubounds_t)
    return lbo, ubo


def _dp_verifier_xla(lbounds, ubounds, *, true_label):
    """Plain fused-XLA path for tiny batches (avoids pallas_call overhead)."""
    lb = lbounds.astype(jnp.float32)
    ub = ubounds.astype(jnp.float32)
    t = int(true_label)
    N = lb.shape[-1]
    keep = [i for i in range(N) if i != t]
    lbo = lb[:, t:t + 1] - ub[:, keep]
    ubo = ub[:, t:t + 1] - lb[:, keep]
    return lbo, ubo


def dp_verifier_forward(lbounds, ubounds, *, true_label, use_pallas=None):
    """DP_Verifier.forward on a concrete root DP_Shape (batch-major interface).

    lbounds, ubounds : (B, N) concrete bounds of the root shape (N = labels).
    true_label       : static Python int.
    Returns (lb_out, ub_out), each (B, N-1) float32 -- identical semantics to
    the PyTorch module (the bias is identically zero and therefore omitted).

    Callers that can hold bounds labels-first should call
    `dp_verifier_forward_labels_first` directly and skip the transposes here.
    """
    B, N = lbounds.shape
    assert ubounds.shape == (B, N)
    if use_pallas is None:
        use_pallas = B >= 1024          # tiny problems: let XLA fuse it
    if not use_pallas:
        return _dp_verifier_xla(lbounds, ubounds, true_label=true_label)
    # Wrapper-side layout plumbing: put the batch on the 128-lane axis.
    lbo_t, ubo_t = dp_verifier_forward_labels_first(
        lbounds.T, ubounds.T, true_label=true_label)
    return lbo_t.T, ubo_t.T


# ---------------------------------------------------------------------------
# Glue matching the PyTorch module (host-side, tiny)
# ---------------------------------------------------------------------------
def make_verifier_params(num_labels: int, true_label: int):
    """Materializes DP_Verifier's (weight, bias) -- used only for the reference."""
    keep_idx = jnp.array([i for i in range(num_labels) if i != true_label])
    weight = -jnp.eye(num_labels, dtype=jnp.float32)[keep_idx, :]      # (M, N)
    weight = weight.at[:, true_label].set(1.0)
    bias = jnp.zeros((1, num_labels - 1), dtype=jnp.float32)           # (1, M)
    return weight, bias


def dp_shape_from_eps(x, eps, clamp=(0.0, 1.0)):
    """DP_Shape.from_eps: concrete bounds of the root shape (elementwise glue)."""
    lo, hi = clamp
    return jnp.clip(x - eps, lo, hi), jnp.clip(x + eps, lo, hi)


# ---------------------------------------------------------------------------
# Pure-JAX reference (mirrors DP_Shape.resolve with the dense weight)
# ---------------------------------------------------------------------------
def _reference(lb, ub, W, b):
    Wp = jnp.maximum(W, 0.0)
    Wn = jnp.minimum(W, 0.0)
    lb_out = lb @ Wp.T + ub @ Wn.T + b
    ub_out = ub @ Wp.T + lb @ Wn.T + b
    return lb_out, ub_out


if __name__ == "__main__":
    num_labels = 10
    true_label = 3
    eps = jnp.float32(0.05)

    key = jax.random.PRNGKey(0)
    k0, k1 = jax.random.split(key)

    weight, bias = make_verifier_params(num_labels, true_label)

    # --- module-shaped test (batch=2), forcing the Pallas kernel ------------
    batch = 2
    x = jax.random.uniform(k0, (batch, num_labels), dtype=jnp.float32)
    lbounds, ubounds = dp_shape_from_eps(x, eps, clamp=(0.0, 1.0))

    lb_out, ub_out = dp_verifier_forward(
        lbounds, ubounds, true_label=true_label, use_pallas=True)
    jax.block_until_ready((lb_out, ub_out))

    lb_ref, ub_ref = _reference(lbounds, ubounds, weight, bias)
    assert lb_out.shape == (batch, num_labels - 1)
    assert ub_out.shape == (batch, num_labels - 1)
    assert jnp.allclose(lb_out, lb_ref, atol=1e-6, rtol=1e-6)
    assert jnp.allclose(ub_out, ub_ref, atol=1e-6, rtol=1e-6)
    assert bool(jnp.all(lb_out <= ub_out))

    # --- lane-dense fast path with a ragged batch (exercises cdiv tail) -----
    batch2 = 2085                      # not a multiple of the 128-lane tile
    x2 = jax.random.uniform(k1, (batch2, num_labels), dtype=jnp.float32)
    lb2, ub2 = dp_shape_from_eps(x2, eps, clamp=(0.0, 1.0))
    lbo_t, ubo_t = dp_verifier_forward_labels_first(
        lb2.T, ub2.T, true_label=true_label)
    jax.block_until_ready((lbo_t, ubo_t))

    lb2_ref, ub2_ref = _reference(lb2, ub2, weight, bias)
    assert lbo_t.shape == (num_labels - 1, batch2)
    assert ubo_t.shape == (num_labels - 1, batch2)
    assert jnp.allclose(lbo_t.T, lb2_ref, atol=1e-6, rtol=1e-6)
    assert jnp.allclose(ubo_t.T, ub2_ref, atol=1e-6, rtol=1e-6)
    assert bool(jnp.all(lbo_t <= ubo_t))

    # TODO(synk): DP_Shape.backsub() over arbitrarily deep parent-transform
    # chains is host-side graph traversal; only the root-resolve step that
    # DP_Verifier.forward actually executes is implemented in-kernel.

    print("KERNEL_OK")
</pallas_src>

<mosaic_0001>
module attributes {stable_mosaic.version = 11 : i64} {
  func.func @_dp_verifier_kernel(%arg0: i32, %arg1: memref<10x2xf32, #tpu.memory_space<vmem>>, %arg2: memref<10x2xf32, #tpu.memory_space<vmem>>, %arg3: memref<9x2xf32, #tpu.memory_space<vmem>>, %arg4: memref<9x2xf32, #tpu.memory_space<vmem>>) attributes {dimension_semantics = [#tpu.dimension_semantics<parallel>], iteration_bounds = array<i64: 1>, scalar_prefetch = 0 : i64, scratch_operands = 0 : i64, tpu.core_type = #tpu.core_type<tc>, window_params = [{transform_indices = @transform_0, window_bounds = array<i64: 10, 2>}, {transform_indices = @transform_1, window_bounds = array<i64: 10, 2>}, {transform_indices = @transform_2, window_bounds = array<i64: 9, 2>}, {transform_indices = @transform_3, window_bounds = array<i64: 9, 2>}]} {
    %c0 = arith.constant 0 : index
    %c0_0 = arith.constant 0 : index
    %0 = vector.load %arg1[%c0, %c0_0] : memref<10x2xf32, #tpu.memory_space<vmem>>, vector<10x2xf32>
    %c0_1 = arith.constant 0 : index
    %c0_2 = arith.constant 0 : index
    %1 = vector.load %arg2[%c0_1, %c0_2] : memref<10x2xf32, #tpu.memory_space<vmem>>, vector<10x2xf32>
    %2 = vector.extract_strided_slice %0 {offsets = [3, 0], sizes = [1, 2], strides = [1, 1]} : vector<10x2xf32> to vector<1x2xf32>
    %3 = vector.extract_strided_slice %1 {offsets = [3, 0], sizes = [1, 2], strides = [1, 1]} : vector<10x2xf32> to vector<1x2xf32>
    %4 = vector.extract_strided_slice %1 {offsets = [0, 0], sizes = [3, 2], strides = [1, 1]} : vector<10x2xf32> to vector<3x2xf32>
    %5 = vector.broadcast %2 : vector<1x2xf32> to vector<3x2xf32>
    %6 = arith.subf %5, %4 : vector<3x2xf32>
    %c0_3 = arith.constant 0 : index
    %c0_4 = arith.constant 0 : index
    %7 = vector.load %arg3[%c0_3, %c0_4] : memref<9x2xf32, #tpu.memory_space<vmem>>, vector<3x2xf32>
    tpu.vector_store %arg3[%c0_3, %c0_4], %6 {strides = array<i32>} : memref<9x2xf32, #tpu.memory_space<vmem>>, vector<3x2xf32>,
    %8 = vector.extract_strided_slice %0 {offsets = [0, 0], sizes = [3, 2], strides = [1, 1]} : vector<10x2xf32> to vector<3x2xf32>
    %9 = vector.broadcast %3 : vector<1x2xf32> to vector<3x2xf32>
    %10 = arith.subf %9, %8 : vector<3x2xf32>
    %c0_5 = arith.constant 0 : index
    %c0_6 = arith.constant 0 : index
    %11 = vector.load %arg4[%c0_5, %c0_6] : memref<9x2xf32, #tpu.memory_space<vmem>>, vector<3x2xf32>
    tpu.vector_store %arg4[%c0_5, %c0_6], %10 {strides = array<i32>} : memref<9x2xf32, #tpu.memory_space<vmem>>, vector<3x2xf32>,
    %12 = vector.extract_strided_slice %1 {offsets = [4, 0], sizes = [6, 2], strides = [1, 1]} : vector<10x2xf32> to vector<6x2xf32>
    %13 = vector.broadcast %2 : vector<1x2xf32> to vector<6x2xf32>
    %14 = arith.subf %13, %12 : vector<6x2xf32>
    %c3 = arith.constant 3 : index
    %c0_7 = arith.constant 0 : index
    %15 = vector.load %arg3[%c3, %c0_7] : memref<9x2xf32, #tpu.memory_space<vmem>>, vector<6x2xf32>
    tpu.vector_store %arg3[%c3, %c0_7], %14 {strides = array<i32>} : memref<9x2xf32, #tpu.memory_space<vmem>>, vector<6x2xf32>,
    %16 = vector.extract_strided_slice %0 {offsets = [4, 0], sizes = [6, 2], strides = [1, 1]} : vector<10x2xf32> to vector<6x2xf32>
    %17 = vector.broadcast %3 : vector<1x2xf32> to vector<6x2xf32>
    %18 = arith.subf %17, %16 : vector<6x2xf32>
    %c3_8 = arith.constant 3 : index
    %c0_9 = arith.constant 0 : index
    %19 = vector.load %arg4[%c3_8, %c0_9] : memref<9x2xf32, #tpu.memory_space<vmem>>, vector<6x2xf32>
    tpu.vector_store %arg4[%c3_8, %c0_9], %18 {strides = array<i32>} : memref<9x2xf32, #tpu.memory_space<vmem>>, vector<6x2xf32>,
    return
  }
  func.func @transform_0(%arg0: i32) -> (i32, i32) {
    %c0_i32 = arith.constant 0 : i32
    %c0_i32_0 = arith.constant 0 : i32
    return %c0_i32, %arg0 : i32, i32
  }
  func.func @transform_1(%arg0: i32) -> (i32, i32) {
    %c0_i32 = arith.constant 0 : i32
    %c0_i32_0 = arith.constant 0 : i32
    return %c0_i32, %arg0 : i32, i32
  }
  func.func @transform_2(%arg0: i32) -> (i32, i32) {
    %c0_i32 = arith.constant 0 : i32
    %c0_i32_0 = arith.constant 0 : i32
    return %c0_i32, %arg0 : i32, i32
  }
  func.func @transform_3(%arg0: i32) -> (i32, i32) {
    %c0_i32 = arith.constant 0 : i32
    %c0_i32_0 = arith.constant 0 : i32
    return %c0_i32, %arg0 : i32, i32
  }
}

</mosaic_0001>

<bundles_post_ra>
// kernel: tpu_custom_call.1
= control target key start
LH: loop header
LB: loop body
LE: loop exit
PB: predicated region body
PF: predicated region fallthrough
CT: control target
= control target key end

     0   :  { %vm19_vm0 = vcmask 10240   ;;  %vm25_vm1 = vcmask 15364   ;;  %vm27_vm2 = vcmask 9216   ;;  %s90_s0 = inlined_call_operand.vmem [shape: f32[10,2], index: 0, kind: input, shape index: {}]   ;;  %s91_s1 = inlined_call_operand.vmem [shape: f32[10,2], index: 1, kind: input, shape index: {}]   ;;  %s92_s2 = inlined_call_operand.vmem [shape: f32[9,2], index: 2, kind: output, shape index: {0}]   ;;  %s93_s3 = inlined_call_operand.vmem [shape: f32[9,2], index: 3, kind: output, shape index: {1}]  }
   0x1   :  { %v13_v0 = vld [vmem:[%s90_s0] sm:$0xff]  ;;  %v16_v4 = vld [vmem:[%s91_s1 + $0x8] sm:$0x3] }
   0x2   :  { %v15_v1 = vld [vmem:[%s91_s1] sm:$0xff]  ;;  %v17_v2 = vperm.slane %v13_v0, 3  ;;  %v14_v7 = vld [vmem:[%s90_s0 + $0x8] sm:$0x3] }
   0x3   :  { %v21_v3 = vperm.slane %v15_v1, 3 }
   0x4   :  { %v18_v5 = vsub.f32 %v17_v2, %v15_v1  ;;  %v24_v8 = vsub.f32 %v17_v2, %v16_v4 }
   0x5   :  { %v22_v6 = vsub.f32 %v21_v3, %v13_v0  ;;  %v29_v9 = vsub.f32 %v21_v3, %v14_v7 }
   0x6   :  { %20 = vst.msk [vmem:[%s92_s2] sm:$0x7] %vm19_vm0, %v18_v5 }
   0x7   :  { %23 = vst.msk [vmem:[%s93_s3] sm:$0x7] %vm19_vm0, %v22_v6 }
   0x8   :  { %26 = vst.msk [vmem:[%s92_s2 - $0x1] sm:$0xf0] %vm25_vm1, %v18_v5 }
   0x9   :  { %30 = vst.msk [vmem:[%s93_s3 - $0x1] sm:$0xf0] %vm25_vm1, %v22_v6 }
   0xa   :  { %28 = vst.msk [vmem:[%s92_s2 + $0x7] sm:$0x3] %vm27_vm2, %v24_v8 }
   0xb   :  { %31 = vst.msk [vmem:[%s93_s3 + $0x7] sm:$0x3] %vm27_vm2, %v29_v9 }

</bundles_post_ra>
